<compile_context>
chip_gen: v5e
topology: v5e:2x2
jax: 0.10.0
libtpu: 0.0.40
codegen_flags: <defaults>
</compile_context>

<pallas_src>
import functools
from enum import Enum
from typing import Dict, Tuple, Union

import jax
import jax.numpy as jnp
from jax.experimental import pallas as pl
from jax.experimental.pallas import tpu as pltpu


class PoolingStrategy(str, Enum):
    CLS = "cls"
    MEAN = "mean"
    MAX = "max"
    FL_AVG_POOLING = "first_last_avg"


# --------------------------- VMEM budgets (generation aware) -------------------------

@functools.lru_cache(maxsize=None)
def _vmem_budgets() -> Tuple[int, int]:
    """Returns (vmem_limit_bytes, streamed-tile budget).

    128 MiB parts (v5e/v6e) -> ~96 MiB limit / 48 MiB tile budget;
    64 MiB parts (v7x)      -> ~48 MiB limit / 24 MiB tile budget;
    conservative 48/24 MiB fallback if the query is unavailable.
    """
    cap = None
    try:
        cap = getattr(pltpu.get_tpu_info(), "vmem_capacity_bytes", None)
    except Exception:
        cap = None
    if not cap:
        cap = 64 * 1024 * 1024
    limit = min((int(cap) * 3) // 4, 96 * 1024 * 1024)
    limit = max(limit, 32 * 1024 * 1024)
    return limit, limit // 2


def _compiler_params(n_grid_axes: int) -> pltpu.CompilerParams:
    limit, _ = _vmem_budgets()
    sem = ("parallel",) + ("arbitrary",) * (n_grid_axes - 1)
    return pltpu.CompilerParams(dimension_semantics=sem, vmem_limit_bytes=limit)


# ------------------------------- tile selection ---------------------------------------

def _seq_tile_candidates(S: int):
    # tS must be a multiple of 128 (lane-dense mask tiling) or the full sequence length.
    return [S] + [t for t in (2048, 1024, 512, 256, 128) if t < S and S % t == 0]


def _pick_tiles(B: int, S: int, H: int, itemsize: int, n_streamed: int, budget: int):
    """Pick (tB, tS) maximizing the per-step block (fewest grid steps, tie-break on a
    larger / more contiguous sequence tile) under the double-buffered VMEM budget.
    tB is capped at 8 and at B//2 so the parallel axis keeps >= 2 steps (v7x dual-TC).
    """
    tS_cands = _seq_tile_candidates(S)
    tB_cands = [t for t in (8, 4, 2, 1) if B % t == 0 and B // t >= 2] or [1]
    # TODO(synk): when B == 1 the parallel axis has a single step; an H-split parallel
    # axis would feed both v7x TensorCores but is not implemented here.
    best = None
    for tS in tS_cands:
        for tB in tB_cands:
            if 2 * n_streamed * tB * tS * H * itemsize <= budget:
                key = (tB * tS, tS)
                if best is None or key > best[0]:
                    best = (key, tB, tS)
    if best is None:
        # TODO(synk): even the smallest legal tile exceeds the budget (huge H with an
        # odd sequence length); proceed with the minimum legal tile anyway.
        return 1, tS_cands[-1]
    return best[1], best[2]


def _pick_contrib_seq_tile(S: int, H: int, lr_itemsize: int, budget: int) -> int:
    cands = _seq_tile_candidates(S)
    for t in cands:
        if 2 * t * H * lr_itemsize <= budget // 2:
            return t
    return cands[-1]


def _pick_contrib_batch_tile(B: int, H: int, tS: int, lr_itemsize: int, budget: int) -> int:
    def fits(tb):
        return (tb * H * 4 + 2 * tb * tS * 4 + 2 * tS * H * lr_itemsize) <= budget

    if fits(B):
        return B          # whole batch resident -> last_row streamed exactly once overall
    for tb in (512, 256, 128, 64, 32, 16, 8):   # multiples of 8 satisfy the (8,128) rule
        if tb < B and B % tb == 0 and fits(tb):
            return tb
    return B              # TODO(synk): oversized fallback for extreme B*H products


# ----------------------------- Pallas kernels -----------------------------------------

def _mean_kernel(x_ref, m_ref, o_ref, den_ref, *, tB):
    # x_ref: (tB, tS, H), m_ref: (tB, 1, tS) f32, o_ref: (tB, 1, H) f32 (resident acc),
    # den_ref: (tB, 1, 1) f32 scratch.
    s = pl.program_id(1)

    @pl.when(s == 0)
    def _():
        o_ref[...] = jnp.zeros_like(o_ref)
        den_ref[...] = jnp.zeros_like(den_ref)

    for i in range(tB):                                  # small static unroll over batch tile
        x_i = x_ref[i]                                   # (tS, H)
        m_i = m_ref[i]                                   # (1, tS) f32
        # Masked sum on the MXU: (1, tS) @ (tS, H), f32 accumulation in the output block.
        o_ref[i] += jnp.dot(m_i.astype(x_i.dtype), x_i, preferred_element_type=jnp.float32)
        den_ref[i] += jnp.sum(m_i, axis=-1, keepdims=True)

    @pl.when(s == pl.num_programs(1) - 1)
    def _():
        # TODO(synk): an all-zero mask row yields inf/NaN, matching the PyTorch reference.
        o_ref[...] = o_ref[...] * pl.reciprocal(den_ref[...], approx=False)


def _fl_avg_kernel(x_ref, m_ref, c_ref, o_ref, den_ref, *, tB):
    # x_ref: first-layer hidden states (tB, tS, H); c_ref: precomputed last_row
    # contribution (tB, 1, H) f32; rest as in _mean_kernel.
    s = pl.program_id(1)

    @pl.when(s == 0)
    def _():
        o_ref[...] = jnp.zeros_like(o_ref)
        den_ref[...] = jnp.zeros_like(den_ref)

    for i in range(tB):
        x_i = x_ref[i]
        m_i = m_ref[i]
        o_ref[i] += jnp.dot(m_i.astype(x_i.dtype), x_i, preferred_element_type=jnp.float32)
        den_ref[i] += jnp.sum(m_i, axis=-1, keepdims=True)

    @pl.when(s == pl.num_programs(1) - 1)
    def _():
        inv = pl.reciprocal(2.0 * den_ref[...], approx=False)
        o_ref[...] = (o_ref[...] + c_ref[...]) * inv


def _last_contrib_kernel(m_ref, lr_ref, o_ref):
    # m_ref: (tBc, tS) f32 mask, lr_ref: (tS, H) batch-invariant last_row,
    # o_ref: (tBc, H) f32 resident accumulator. Computes mask @ last_row.
    s = pl.program_id(1)

    @pl.when(s == 0)
    def _():
        o_ref[...] = jnp.zeros_like(o_ref)

    o_ref[...] += jnp.dot(m_ref[...].astype(lr_ref.dtype), lr_ref[...],
                          preferred_element_type=jnp.float32)


def _max_kernel(x_ref, m_ref, o_ref, *, tB):
    # x_ref: (tB, tS, H) input dtype, m_ref: (tB, 1, tS) f32 (lane-dense),
    # o_ref: (tB, 1, H) f32 resident running max.
    s = pl.program_id(1)

    @pl.when(s == 0)
    def _():
        o_ref[...] = jnp.full_like(o_ref, -jnp.inf)

    for i in range(tB):
        x_i = x_ref[i]                                           # (tS, H), input dtype
        # Lane-dense mask row -> column on the XLU; multiplicative masking in the input
        # dtype (exact: 0/1 mask), faithful to the PyTorch reference.
        col = jnp.transpose(m_ref[i]).astype(x_i.dtype)          # (tS, 1)
        part = jnp.max(x_i * col, axis=0, keepdims=True)         # (1, H), input dtype
        o_ref[i] = jnp.maximum(o_ref[i], part.astype(jnp.float32))


def _cls_kernel(x_ref, o_ref, *, row):
    # x_ref: (1, tS, H) — only the small block containing the CLS row was DMA'd.
    o_ref[...] = x_ref[:, row:row + 1, :]


# ------------------------------ wrappers -----------------------------------------------

def _mean_pool(x, attention_mask):
    B, S, H = x.shape
    _, budget = _vmem_budgets()
    tB, tS = _pick_tiles(B, S, H, jnp.dtype(x.dtype).itemsize, n_streamed=1, budget=budget)
    mask3 = attention_mask.astype(jnp.float32).reshape(B, 1, S)   # lane-dense mask
    out = pl.pallas_call(
        functools.partial(_mean_kernel, tB=tB),
        out_shape=jax.ShapeDtypeStruct((B, 1, H), jnp.float32),
        grid=(B // tB, S // tS),
        in_specs=[
            pl.BlockSpec((tB, tS, H), lambda b, s: (b, s, 0)),
            pl.BlockSpec((tB, 1, tS), lambda b, s: (b, 0, s)),
        ],
        out_specs=pl.BlockSpec((tB, 1, H), lambda b, s: (b, 0, 0)),
        scratch_shapes=[pltpu.VMEM((tB, 1, 1), jnp.float32)],
        compiler_params=_compiler_params(2),
    )(x, mask3)
    return out.reshape(B, H)


def _last_row_contrib(mask_f32, last_row):
    """contrib[b, h] = sum_s mask[b, s] * last_row[s, h]; last_row streamed once."""
    B, S = mask_f32.shape
    _, budget = _vmem_budgets()
    H = last_row.shape[-1]
    lr_itemsize = jnp.dtype(last_row.dtype).itemsize
    tS = _pick_contrib_seq_tile(S, H, lr_itemsize, budget)
    tBc = _pick_contrib_batch_tile(B, H, tS, lr_itemsize, budget)
    out = pl.pallas_call(
        _last_contrib_kernel,
        out_shape=jax.ShapeDtypeStruct((B, H), jnp.float32),
        grid=(B // tBc, S // tS),
        in_specs=[
            pl.BlockSpec((tBc, tS), lambda b, s: (b, s)),
            pl.BlockSpec((tS, H), lambda b, s: (s, 0)),
        ],
        out_specs=pl.BlockSpec((tBc, H), lambda b, s: (b, 0)),
        compiler_params=_compiler_params(2),
    )(mask_f32, last_row)
    return out


def _fl_avg_pool(first, last_row, attention_mask):
    B, S, H = first.shape
    _, budget = _vmem_budgets()
    mask_f32 = attention_mask.astype(jnp.float32)

    # Stage 1: batch-invariant last_row contribution (mask @ last_row), single stream of
    # last_row regardless of batch size.
    contrib3 = _last_row_contrib(mask_f32, last_row).reshape(B, 1, H)

    # Stage 2: stream the first-layer hidden states and add contrib at finalize.
    tB, tS = _pick_tiles(B, S, H, jnp.dtype(first.dtype).itemsize, n_streamed=1, budget=budget)
    mask3 = mask_f32.reshape(B, 1, S)
    out = pl.pallas_call(
        functools.partial(_fl_avg_kernel, tB=tB),
        out_shape=jax.ShapeDtypeStruct((B, 1, H), jnp.float32),
        grid=(B // tB, S // tS),
        in_specs=[
            pl.BlockSpec((tB, tS, H), lambda b, s: (b, s, 0)),
            pl.BlockSpec((tB, 1, tS), lambda b, s: (b, 0, s)),
            pl.BlockSpec((tB, 1, H), lambda b, s: (b, 0, 0)),
        ],
        out_specs=pl.BlockSpec((tB, 1, H), lambda b, s: (b, 0, 0)),
        scratch_shapes=[pltpu.VMEM((tB, 1, 1), jnp.float32)],
        compiler_params=_compiler_params(2),
    )(first, mask3, contrib3)
    return out.reshape(B, H)


def _max_pool(x, attention_mask):
    B, S, H = x.shape
    _, budget = _vmem_budgets()
    tB, tS = _pick_tiles(B, S, H, jnp.dtype(x.dtype).itemsize, n_streamed=1, budget=budget)
    mask3 = attention_mask.astype(jnp.float32).reshape(B, 1, S)   # lane-dense mask
    out = pl.pallas_call(
        functools.partial(_max_kernel, tB=tB),
        out_shape=jax.ShapeDtypeStruct((B, 1, H), jnp.float32),
        grid=(B // tB, S // tS),
        in_specs=[
            pl.BlockSpec((tB, tS, H), lambda b, s: (b, s, 0)),
            pl.BlockSpec((tB, 1, tS), lambda b, s: (b, 0, s)),
        ],
        out_specs=pl.BlockSpec((tB, 1, H), lambda b, s: (b, 0, 0)),
        compiler_params=_compiler_params(2),
    )(x, mask3)
    return out.reshape(B, H)


def _cls_pool(x, cls_in_first):
    B, S, H = x.shape
    idx = 0 if cls_in_first else S - 1
    itemsize = jnp.dtype(x.dtype).itemsize
    min_rows = 8 * max(1, 4 // max(1, itemsize))     # 8 f32 / 16 bf16 / 32 int8
    tS = min_rows if (S >= min_rows and S % min_rows == 0) else S
    blk, row = idx // tS, idx % tS
    kernel = functools.partial(_cls_kernel, row=row)
    out = pl.pallas_call(
        kernel,
        out_shape=jax.ShapeDtypeStruct((B, 1, H), x.dtype),
        grid=(B,),
        in_specs=[pl.BlockSpec((1, tS, H), lambda b: (b, blk, 0))],
        out_specs=pl.BlockSpec((1, 1, H), lambda b: (b, 0, 0)),
        compiler_params=_compiler_params(1),
    )(x)
    return out.reshape(B, H)


class HiddenStatesPooling:
    """JAX/Pallas port of tt4l HiddenStatesPooling (no trainable parameters)."""

    def __init__(
        self,
        pool_strategy: Union[str, PoolingStrategy] = PoolingStrategy.FL_AVG_POOLING,
        cls_in_first: bool = True,
        hidden_state_name: str = "hidden_states",
        last_hidden_state_name: str = "last_hidden_state",
    ):
        if isinstance(pool_strategy, PoolingStrategy):
            pool_strategy = pool_strategy.value
        self._pool_strategy = PoolingStrategy(pool_strategy)
        self.cls_in_first = cls_in_first
        self.hidden_state_name = hidden_state_name
        self.last_hidden_state_name = last_hidden_state_name

    @property
    def cls_index(self):
        return 0 if self.cls_in_first else -1

    @property
    def pool_strategy(self):
        return self._pool_strategy

    def __call__(self, output: Dict, attention_mask: jnp.ndarray):
        return getattr(self, self._pool_strategy.value)(
            output=output, attention_mask=attention_mask
        )

    def cls(self, output: Dict, attention_mask: jnp.ndarray):
        return _cls_pool(output[self.last_hidden_state_name], self.cls_in_first)

    def mean(self, output: Dict, attention_mask: jnp.ndarray):
        return _mean_pool(output[self.last_hidden_state_name], attention_mask)

    def max(self, output: Dict, attention_mask: jnp.ndarray):
        return _max_pool(output[self.last_hidden_state_name], attention_mask)

    def first_last_avg(self, output: Dict, attention_mask: jnp.ndarray):
        first = output[self.hidden_state_name][1]               # (B, S, H) first layer output
        # Faithful to the reference: `last_hidden_state[-1]` indexes the *batch* axis,
        # yielding a (S, H) row broadcast across the batch. It is kept as a 2-D
        # batch-invariant input (no HBM broadcast materialization).
        last_row = output[self.last_hidden_state_name][-1]      # (S, H)
        return _fl_avg_pool(first, last_row, attention_mask)


# ------------------------------ demo / check ---------------------------------

if __name__ == "__main__":
    B, S, H, L = 2, 8, 32, 3  # batch, seq, hidden, layers (hidden_states has L+1 entries)

    key = jax.random.PRNGKey(0)
    k_hs, k_last = jax.random.split(key)

    hidden_states = jax.random.normal(k_hs, (L + 1, B, S, H), dtype=jnp.float32)
    last_hidden_state = jax.random.normal(k_last, (B, S, H), dtype=jnp.float32)
    attention_mask = jnp.array(
        [[1, 1, 1, 1, 1, 0, 0, 0],
         [1, 1, 1, 1, 1, 1, 1, 0]], dtype=jnp.float32
    )

    output = {
        "hidden_states": hidden_states,          # indexable along the layer axis
        "last_hidden_state": last_hidden_state,  # (B, S, H)
    }

    # Default strategy: first_last_avg (FL_AVG_POOLING)
    pooler = HiddenStatesPooling()
    pooled = pooler(output, attention_mask)
    jax.block_until_ready(pooled)

    # Pure-JAX references for every strategy.
    m3 = attention_mask[:, :, None]
    ref_fl = (
        jnp.sum(hidden_states[1] * m3, axis=1)
        + jnp.sum(jnp.broadcast_to(last_hidden_state[-1], (B, S, H)) * m3, axis=1)
    ) / (2.0 * jnp.sum(attention_mask, axis=1)[:, None])
    assert pooled.shape == (B, H)
    assert jnp.allclose(pooled, ref_fl, atol=1e-5, rtol=1e-5)

    mean_out = HiddenStatesPooling("mean")(output, attention_mask)
    ref_mean = jnp.sum(last_hidden_state * m3, axis=1) / jnp.sum(attention_mask, axis=1)[:, None]
    assert jnp.allclose(mean_out, ref_mean, atol=1e-5, rtol=1e-5)

    max_out = HiddenStatesPooling("max")(output, attention_mask)
    ref_max = jnp.max(last_hidden_state * m3, axis=-2)
    assert jnp.allclose(max_out, ref_max, atol=1e-5, rtol=1e-5)

    cls_out = HiddenStatesPooling("cls")(output, attention_mask)
    ref_cls = last_hidden_state[:, 0]
    assert jnp.allclose(cls_out, ref_cls, atol=1e-5, rtol=1e-5)

    cls_last_out = HiddenStatesPooling("cls", cls_in_first=False)(output, attention_mask)
    assert jnp.allclose(cls_last_out, last_hidden_state[:, -1], atol=1e-5, rtol=1e-5)

    jax.block_until_ready((mean_out, max_out, cls_out, cls_last_out))
    print("KERNEL_OK")
</pallas_src>

<mosaic_0001>
module attributes {stable_mosaic.version = 11 : i64} {
  func.func @_last_contrib_kernel(%arg0: i32, %arg1: i32, %arg2: memref<2x8xf32, #tpu.memory_space<vmem>>, %arg3: memref<8x32xf32, #tpu.memory_space<vmem>>, %arg4: memref<2x32xf32, #tpu.memory_space<vmem>>) attributes {dimension_semantics = [#tpu.dimension_semantics<parallel>, #tpu.dimension_semantics<arbitrary>], iteration_bounds = array<i64: 1, 1>, scalar_prefetch = 0 : i64, scratch_operands = 0 : i64, tpu.core_type = #tpu.core_type<tc>, window_params = [{transform_indices = @transform_0, window_bounds = array<i64: 2, 8>}, {transform_indices = @transform_1, window_bounds = array<i64: 8, 32>}, {transform_indices = @transform_2, window_bounds = array<i64: 2, 32>}]} {
    %c0_i32 = arith.constant 0 : i32
    %0 = arith.cmpi eq, %arg1, %c0_i32 : i32
    %1 = arith.extui %0 : i1 to i32
    %c0_i32_0 = arith.constant 0 : i32
    %2 = arith.cmpi ne, %1, %c0_i32_0 : i32
    scf.if %2 {
      %cst_8 = arith.constant 0.000000e+00 : f32
      %9 = vector.broadcast %cst_8 : f32 to vector<2x32xf32>
      %c0_9 = arith.constant 0 : index
      %c0_10 = arith.constant 0 : index
      %10 = vector.load %arg4[%c0_9, %c0_10] : memref<2x32xf32, #tpu.memory_space<vmem>>, vector<2x32xf32>
      tpu.vector_store %arg4[%c0_9, %c0_10], %9 {strides = array<i32>} : memref<2x32xf32, #tpu.memory_space<vmem>>, vector<2x32xf32>,
    } else {
    }
    %c0 = arith.constant 0 : index
    %c0_1 = arith.constant 0 : index
    %3 = vector.load %arg4[%c0, %c0_1] : memref<2x32xf32, #tpu.memory_space<vmem>>, vector<2x32xf32>
    %c0_2 = arith.constant 0 : index
    %c0_3 = arith.constant 0 : index
    %4 = vector.load %arg2[%c0_2, %c0_3] : memref<2x8xf32, #tpu.memory_space<vmem>>, vector<2x8xf32>
    %c0_4 = arith.constant 0 : index
    %c0_5 = arith.constant 0 : index
    %5 = vector.load %arg3[%c0_4, %c0_5] : memref<8x32xf32, #tpu.memory_space<vmem>>, vector<8x32xf32>
    %cst = arith.constant dense<0.000000e+00> : vector<2x32xf32>
    %6 = tpu.matmul %4, %5, %cst {dimension_numbers = #tpu.dot_dimension_numbers<[1], [0], [0], [1], [0, 0, 1, 1], [], []>} : vector<2x8xf32>, vector<8x32xf32>, vector<2x32xf32> -> vector<2x32xf32>
    %7 = arith.addf %3, %6 : vector<2x32xf32>
    %c0_6 = arith.constant 0 : index
    %c0_7 = arith.constant 0 : index
    %8 = vector.load %arg4[%c0_6, %c0_7] : memref<2x32xf32, #tpu.memory_space<vmem>>, vector<2x32xf32>
    tpu.vector_store %arg4[%c0_6, %c0_7], %7 {strides = array<i32>} : memref<2x32xf32, #tpu.memory_space<vmem>>, vector<2x32xf32>,
    return
  }
  func.func @transform_0(%arg0: i32, %arg1: i32) -> (i32, i32) {
    %c0_i32 = arith.constant 0 : i32
    return %arg0, %arg1 : i32, i32
  }
  func.func @transform_1(%arg0: i32, %arg1: i32) -> (i32, i32) {
    %c0_i32 = arith.constant 0 : i32
    %c0_i32_0 = arith.constant 0 : i32
    return %arg1, %c0_i32 : i32, i32
  }
  func.func @transform_2(%arg0: i32, %arg1: i32) -> (i32, i32) {
    %c0_i32 = arith.constant 0 : i32
    %c0_i32_0 = arith.constant 0 : i32
    return %arg0, %c0_i32 : i32, i32
  }
}

</mosaic_0001>

<bundles_post_ra>
// kernel: tpu_custom_call.1
= control target key start
LH: loop header
LB: loop body
LE: loop exit
PB: predicated region body
PF: predicated region fallthrough
CT: control target
= control target key end

     0   :  { %7 = vsyncpa [#allocation3], 0  ;;  %s207_s0 = inlined_call_operand.hbm [shape: f32[2,8], index: 0, kind: input, shape index: {}]   ;;  %s208_s1 = inlined_call_operand.hbm [shape: f32[8,32], index: 1, kind: input, shape index: {}]   ;;  %s209_s2 = inlined_call_operand.hbm [shape: f32[2,32], index: 2, kind: output, shape index: {}]  }
   0x1   :  { %8 = vsyncpa [#allocation6], 0 }
   0x2   :  { %9 = vsyncpa [#allocation4], 0  ;;  %s15_s11 = sshll.u32 %s207_s0, 4  ;;  %s177_s12 = smov [#allocation2]   ;;  %s16_s11 = int_to_ptr.hbm [resolvable:$true] %s15_s11 }
   0x3   :  { %s17_s13 = sshll.u32 %s177_s12, 4  ;;  %s26_s16 = sshll.u32 %s208_s1, 4  ;;  %s18_s13 = int_to_ptr.vmem [resolvable:$true] %s17_s13  ;;  %s27_s16 = int_to_ptr.hbm [resolvable:$true] %s26_s16 }
   0x4   :  { %20 = dma.hbm_to_vmem [thread:$0]  %s16_s11, 32, %s18_s13, [#allocation3]  }
   0x5   :  { %s178_s17 = smov [#allocation5]  }
   0x6   :  { %s28_s18 = sshll.u32 %s178_s17, 4  ;;  %s29_s18 = int_to_ptr.vmem [resolvable:$true] %s28_s18 }
   0x7   :  { %31 = dma.hbm_to_vmem [thread:$0]  %s27_s16, 128, %s29_s18, [#allocation6]  }
   0x8   :  { %171 = dma.done.wait [#allocation3], 32  }
   0x9   :  { %172 = vsyncadd [#allocation3], 4294967264 }
   0xa   :  { %173 = dma.done.wait [#allocation6], 128  }
   0xb   :  { %174 = vsyncadd [#allocation6], 4294967168  ;;  %vm44_vm0 = vcmask 254976   ;;  %v179_v0 = vmov 0.0   ;;  %vm49_vm1 = vcmask 64512   ;;  %v48_v1 = vld [vmem:[#allocation5] sm:$0xff] }
   0xc   :  { %45 = vst.msk [vmem:[#allocation7] sm:$0x3] %vm44_vm0, %v179_v0  ;;  %v47_v2 = vld [vmem:[#allocation2] sm:$0x3]  ;;  %68 = vmatpush.msra.mxu0 %v48_v1  ;;  %s180_s0 = smov [#allocation7]   ;;  %s83_s21 = sshll.u32 %s209_s2, 4  ;;  %s84_s21 = int_to_ptr.hbm [resolvable:$true] %s83_s21 }
   0xd   :  { %94 = vmatmul.msk.f32.vlgmr.msra.gmra.mxu0 %vm49_vm1, %v47_v2  ;;  %s81_s1 = sshll.u32 %s180_s0, 4  ;;  %s82_s1 = int_to_ptr.vmem [resolvable:$true] %s81_s1 }
  0x13   :  { %v46_v3 = vld [vmem:[#allocation7] sm:$0x3] }
  0x8a   :  { %v70_v4 = vpop.f32.mrf.mxu0 }
  0x8b   :  { %v73_v5 = vadd.f32 %v70_v4, %v46_v3 }
  0x8d   :  { %75 = vst.msk [vmem:[#allocation7] sm:$0x3] %vm44_vm0, %v73_v5 }
  0x8e   :  { %86 = dma.vmem_to_hbm [thread:$0]  %s82_s1, 32, %s84_s21, [#allocation4]  }
  0x8f   :  { %175 = dma.done.wait [#allocation4], 32  }
  0x90   :  { %176 = vsyncadd [#allocation4], 4294967264 }
  0x91   :  { %91 = vsyncpa [#allocation3], 1 }
  0x92   :  { %92 = vsyncpa [#allocation6], 1 }
  0x93   :  { %93 = vsyncpa [#allocation4], 1 }

</bundles_post_ra>
